<compile_context>
chip_gen: v7x
topology: tpu7x:2x2x1
jax: 0.10.0
libtpu: 0.0.40
codegen_flags: <defaults>
</compile_context>

<pallas_src>
import functools
import numpy as np
import jax
import jax.numpy as jnp
from jax.experimental import pallas as pl
from jax.experimental.pallas import tpu as pltpu


# ----------------------------- Pallas kernel -------------------------------

def sa_layer_kernel(x_ref, pca_ref, xq_ref, es_ref, e2t_ref,
                    wkv_ref, wqp_ref, wl_ref, bl_ref,
                    y_ref, pr_ref, st_ref, *, picked, h, c):
    f32 = jnp.float32
    bf16 = jnp.bfloat16

    x = x_ref[0]        # (C, N)   bf16
    pca = pca_ref[0]    # (C, N)   bf16
    xq = xq_ref[0]      # (N, H)   f32   q projection (shared with the glue pre-reduction)
    es = es_ref[0]      # (N, N)   f32   pre-reduced angle_lrf energy term
    e2t = e2t_ref[0]    # (H, N)   f32   projected AngleEmbedding(angle_pca), pre-transposed
    wkv = wkv_ref[...]  # (H+C, C) bf16  stacked [k_conv.w ; v_conv.w]
    wqp = wqp_ref[...]  # (H+C, C) bf16  stacked [q_conv.w (== k_conv_pca.w, tied) ; v_conv_pca.w]
    wl = wl_ref[...]    # (C, C)   bf16  linear (1x1 conv) weight
    bl = bl_ref[...]    # (C, 1)   f32   linear bias

    n = es.shape[0]

    # Fused 1x1-conv projections: one MXU dot per input tensor (bf16 in, f32 accum).
    kv = jnp.dot(wkv, x, preferred_element_type=f32)       # (H+C, N)
    kpvp = jnp.dot(wqp, pca, preferred_element_type=f32)   # (H+C, N)
    k, v = kv[:h], kv[h:]                                  # (H, N), (C, N)
    kp, vp = kpvp[:h], kpvp[h:]                            # (H, N), (C, N)

    # Energy: k, k_pca and emb2^T all multiply the same q^T on the left, so sum the
    # RHS first and issue a single (N,H)x(H,N) contraction; add the pre-reduced
    # angle_lrf term.  f32 operands so it matches the unrestructured reference.
    energy = jnp.dot(xq, k + kp + e2t, preferred_element_type=f32) + es   # (N, N)

    # Row softmax (f32 on VPU/EUP) + column re-normalization (column sum on the MXU).
    m = jnp.max(energy, axis=-1, keepdims=True)
    p = jnp.exp(energy - m)
    attn = p / jnp.sum(p, axis=-1, keepdims=True)
    colsum = jnp.dot(jnp.ones((1, n), f32), attn, preferred_element_type=f32)  # (1, N)
    attn = attn / (1e-12 + colsum)

    # point_relation: picked row of the softmaxed + column-renormalized attention.
    # (The torch source re-uses the name `energy` after softmax/renorm, so this is
    # intentionally taken after both steps.)
    pr_ref[0] = attn[picked:picked + 1, :]                  # (1, N)

    # Attention-weighted values: one fused (2C, N) x (N, N) bf16 dot for both branches.
    vv = jnp.concatenate([v, vp], axis=0).astype(bf16)      # (2C, N)
    att_b = attn.astype(bf16)
    xr2 = jnp.dot(vv, att_b, preferred_element_type=f32)    # (2C, N)
    x_r = 0.5 * (xr2[:c] + xr2[c:])                         # learn_weight=False: 0.5 / 0.5 mix

    # Final 1x1 conv: linear(x - x_r) with bias.
    xd = (x.astype(f32) - x_r).astype(bf16)
    y = jnp.dot(wl, xd, preferred_element_type=f32) + bl    # (C, N)
    y_ref[0] = y

    # Per-batch partial sums for the BatchNorm in the glue (avoids re-reading y from HBM).
    st_ref[0, :, 0:1] = jnp.sum(y, axis=1, keepdims=True)
    st_ref[0, :, 1:2] = jnp.sum(y * y, axis=1, keepdims=True)


# ------------------------------ JAX glue ------------------------------------

def sinusoidal_embedding(indices, d_model):
    div_term = jnp.exp(jnp.arange(0, d_model, 2, dtype=jnp.float32) *
                       (-np.log(10000.0) / d_model))
    omegas = indices.reshape(-1, 1, 1) * div_term.reshape(1, -1, 1)
    emb = jnp.concatenate([jnp.sin(omegas), jnp.cos(omegas)], axis=2)
    return emb.reshape(indices.shape + (d_model,))


def angle_embedding(angles, w, b, d_model, sigma):
    factor = 180.0 / (np.pi * sigma)
    emb = sinusoidal_embedding(angles * factor, d_model)
    return emb @ w.T + b


def sa_layer_forward(params, x, pca, angle_lrf, angle_pca, picked):
    B, C, N = x.shape
    H = C // 4
    f32, bf16 = jnp.float32, jnp.bfloat16
    sigma = params['sigma']

    # Angle embeddings + their Linear projections (XLA).
    emb1 = angle_embedding(angle_lrf, params['emb1_w'], params['emb1_b'], H, sigma)  # (B,N,N,H)
    emb2 = angle_embedding(angle_pca, params['emb2_w'], params['emb2_b'], H, sigma)  # (B,N,H)

    # bf16 operands at the kernel boundary; accumulation inside the kernel stays f32.
    wq = params['wq'].astype(bf16)   # q_conv.weight IS k_conv_pca.weight (tied in __init__)
    wk = params['wk'].astype(bf16)   # k_conv.weight stays an independent parameter
    wv = params['wv'].astype(bf16)
    wvp = params['wvp'].astype(bf16)
    wl = params['wl'].astype(bf16)
    xb = x.astype(bf16)
    pb = pca.astype(bf16)

    # q projection + pre-reduced angle_lrf energy term, computed once in XLA.
    # Passing the (B,N,N) result instead of the (B,N,N,H) embedding cuts the largest
    # kernel input by Hx and removes the in-kernel (N,N,H) broadcast-reduce.
    xq = jnp.einsum('hc,bcn->bnh', wq, xb, preferred_element_type=f32)   # (B,N,H)
    es = jnp.einsum('bnh,bnmh->bnm', xq, emb1)                           # (B,N,N)
    e2t = jnp.swapaxes(emb2, 1, 2)                                       # (B,H,N) (no in-kernel transpose)

    # Stacked projection weights -> one MXU dot per input tensor inside the kernel.
    wkv = jnp.concatenate([wk, wv], axis=0)    # (H+C, C)
    wqp = jnp.concatenate([wq, wvp], axis=0)   # (H+C, C)

    kernel = functools.partial(sa_layer_kernel, picked=picked, h=H, c=C)
    y, pr, st = pl.pallas_call(
        kernel,
        out_shape=(jax.ShapeDtypeStruct((B, C, N), f32),    # linear(x - x_r)
                   jax.ShapeDtypeStruct((B, 1, N), f32),     # point_relation
                   jax.ShapeDtypeStruct((B, C, 2), f32)),    # per-batch (sum, sum^2) of y
        grid=(B,),
        in_specs=[
            pl.BlockSpec((1, C, N), lambda b: (b, 0, 0)),    # x            (bf16)
            pl.BlockSpec((1, C, N), lambda b: (b, 0, 0)),    # pca          (bf16)
            pl.BlockSpec((1, N, H), lambda b: (b, 0, 0)),    # xq           (f32)
            pl.BlockSpec((1, N, N), lambda b: (b, 0, 0)),    # energy_self  (f32)
            pl.BlockSpec((1, H, N), lambda b: (b, 0, 0)),    # emb2^T       (f32)
            pl.BlockSpec((H + C, C), lambda b: (0, 0)),      # [wk; wv]     (bf16)
            pl.BlockSpec((H + C, C), lambda b: (0, 0)),      # [wq; wv_pca] (bf16)
            pl.BlockSpec((C, C), lambda b: (0, 0)),          # w_linear     (bf16)
            pl.BlockSpec((C, 1), lambda b: (0, 0)),          # b_linear     (f32)
        ],
        out_specs=(
            pl.BlockSpec((1, C, N), lambda b: (b, 0, 0)),
            pl.BlockSpec((1, 1, N), lambda b: (b, 0, 0)),
            pl.BlockSpec((1, C, 2), lambda b: (b, 0, 0)),
        ),
        compiler_params=pltpu.CompilerParams(dimension_semantics=("parallel",)),
    )(xb, pb, xq, es, e2t, wkv, wqp, wl, params['bl'])

    # BatchNorm1d (training-mode batch statistics) from the kernel-emitted partial
    # sums (cross-batch reduction spans the grid -> finished in XLA), exact GELU,
    # residual add.
    cnt = B * N
    mean = jnp.sum(st[:, :, 0], axis=0) / cnt                     # (C,)
    var = jnp.sum(st[:, :, 1], axis=0) / cnt - mean * mean        # (C,)
    yn = (y - mean[None, :, None]) / jnp.sqrt(var + 1e-5)[None, :, None]
    yn = yn * params['bn_gamma'][None, :, None] + params['bn_beta'][None, :, None]
    g = 0.5 * yn * (1.0 + jax.scipy.special.erf(yn / np.sqrt(2.0)))   # exact GELU
    return x + g, pr


# ------------------------- pure-JAX reference (check) ------------------------
# Mirrors the kernel's quantization points (bf16 operands, f32 accumulation) so the
# comparison tolerance can be tight (1e-3) while keeping the module's algebraic form.

def reference_forward(params, x, pca, angle_lrf, angle_pca, picked):
    B, C, N = x.shape
    H = C // 4
    f32, bf16 = jnp.float32, jnp.bfloat16
    wq = params['wq'].astype(bf16)
    wk = params['wk'].astype(bf16)
    wv = params['wv'].astype(bf16)
    wvp = params['wvp'].astype(bf16)
    wl = params['wl'].astype(bf16)
    bl = params['bl']
    xb = x.astype(bf16)
    pb = pca.astype(bf16)

    emb1 = angle_embedding(angle_lrf, params['emb1_w'], params['emb1_b'], H, params['sigma'])
    emb2 = angle_embedding(angle_pca, params['emb2_w'], params['emb2_b'], H, params['sigma'])

    xq = jnp.einsum('hc,bcn->bnh', wq, xb, preferred_element_type=f32)
    k = jnp.einsum('hc,bcn->bhn', wk, xb, preferred_element_type=f32)
    kp = jnp.einsum('hc,bcn->bhn', wq, pb, preferred_element_type=f32)   # tied weight
    v = jnp.einsum('oc,bcn->bon', wv, xb, preferred_element_type=f32)
    vp = jnp.einsum('oc,bcn->bon', wvp, pb, preferred_element_type=f32)

    e = jnp.einsum('bnh,bhm->bnm', xq, k)                  # energy_lrf
    e = e + jnp.einsum('bnh,bnmh->bnm', xq, emb1)          # energy_self
    e = e + jnp.einsum('bnh,bhm->bnm', xq, kp)             # energy_pca
    e = e + jnp.einsum('bnh,bmh->bnm', xq, emb2)           # energy_cross
    attn = jax.nn.softmax(e, axis=-1)
    attn = attn / (1e-12 + attn.sum(axis=1, keepdims=True))
    pr = attn[:, picked, :][:, None, :]

    ab = attn.astype(bf16)
    x_lrf = jnp.einsum('bcn,bnm->bcm', v.astype(bf16), ab, preferred_element_type=f32)
    x_pca = jnp.einsum('bcn,bnm->bcm', vp.astype(bf16), ab, preferred_element_type=f32)
    x_r = 0.5 * x_lrf + 0.5 * x_pca
    xd = (xb.astype(f32) - x_r).astype(bf16)
    y = jnp.einsum('oc,bcn->bon', wl, xd, preferred_element_type=f32) + bl[None, :, :]

    mean = jnp.mean(y, axis=(0, 2), keepdims=True)
    var = jnp.var(y, axis=(0, 2), keepdims=True)
    yn = (y - mean) / jnp.sqrt(var + 1e-5)
    yn = yn * params['bn_gamma'][None, :, None] + params['bn_beta'][None, :, None]
    g = 0.5 * yn * (1.0 + jax.scipy.special.erf(yn / np.sqrt(2.0)))
    return x + g, pr


# ---------------------------------- main -------------------------------------

if __name__ == "__main__":
    B, C, N = 2, 64, 32     # batch, channels, number of points
    H = C // 4
    picked = 3              # args.picked_point_num
    sigma = 15

    key = jax.random.PRNGKey(0)
    keys = jax.random.split(key, 14)
    params = {
        'sigma': sigma,
        'wq':  0.1 * jax.random.normal(keys[0], (H, C), jnp.float32),   # q_conv / k_conv_pca (tied)
        'wk':  0.1 * jax.random.normal(keys[1], (H, C), jnp.float32),
        'wv':  0.1 * jax.random.normal(keys[2], (C, C), jnp.float32),
        'wvp': 0.1 * jax.random.normal(keys[3], (C, C), jnp.float32),
        'wl':  0.1 * jax.random.normal(keys[4], (C, C), jnp.float32),
        'bl':  0.1 * jax.random.normal(keys[5], (C, 1), jnp.float32),
        'emb1_w': 0.1 * jax.random.normal(keys[6], (H, H), jnp.float32),
        'emb1_b': 0.1 * jax.random.normal(keys[7], (H,), jnp.float32),
        'emb2_w': 0.1 * jax.random.normal(keys[8], (H, H), jnp.float32),
        'emb2_b': 0.1 * jax.random.normal(keys[9], (H,), jnp.float32),
        'bn_gamma': jnp.ones((C,), jnp.float32),
        'bn_beta':  jnp.zeros((C,), jnp.float32),
    }

    x = jax.random.normal(keys[10], (B, C, N), jnp.float32)
    pca = jax.random.normal(keys[11], (B, C, N), jnp.float32)
    angle_lrf = jnp.pi * jax.random.uniform(keys[12], (B, N, N), jnp.float32)
    angle_pca = jnp.pi * jax.random.uniform(keys[13], (B, N), jnp.float32)

    out, pr = sa_layer_forward(params, x, pca, angle_lrf, angle_pca, picked)
    out = jax.block_until_ready(out)
    pr = jax.block_until_ready(pr)

    ref_out, ref_pr = reference_forward(params, x, pca, angle_lrf, angle_pca, picked)
    assert out.shape == (B, C, N) and pr.shape == (B, 1, N)
    assert bool(jnp.allclose(out, ref_out, atol=1e-3, rtol=1e-3))
    assert bool(jnp.allclose(pr, ref_pr, atol=1e-3, rtol=1e-3))
    print("KERNEL_OK")
</pallas_src>

<mosaic_0001>
module attributes {stable_mosaic.version = 11 : i64} {
  func.func @sa_layer_kernel(%arg0: i32, %arg1: memref<1x64x32xbf16, #tpu.memory_space<vmem>>, %arg2: memref<1x64x32xbf16, #tpu.memory_space<vmem>>, %arg3: memref<1x32x16xf32, #tpu.memory_space<vmem>>, %arg4: memref<1x32x32xf32, #tpu.memory_space<vmem>>, %arg5: memref<1x16x32xf32, #tpu.memory_space<vmem>>, %arg6: memref<80x64xbf16, #tpu.memory_space<vmem>>, %arg7: memref<80x64xbf16, #tpu.memory_space<vmem>>, %arg8: memref<64x64xbf16, #tpu.memory_space<vmem>>, %arg9: memref<64x1xf32, #tpu.memory_space<vmem>>, %arg10: memref<1x64x32xf32, #tpu.memory_space<vmem>>, %arg11: memref<1x1x32xf32, #tpu.memory_space<vmem>>, %arg12: memref<1x64x2xf32, #tpu.memory_space<vmem>>) attributes {dimension_semantics = [#tpu.dimension_semantics<parallel>], iteration_bounds = array<i64: 2>, scalar_prefetch = 0 : i64, scratch_operands = 0 : i64, tpu.core_type = #tpu.core_type<tc>, window_params = [{transform_indices = @transform_0, window_bounds = array<i64: 1, 64, 32>}, {transform_indices = @transform_1, window_bounds = array<i64: 1, 64, 32>}, {transform_indices = @transform_2, window_bounds = array<i64: 1, 32, 16>}, {transform_indices = @transform_3, window_bounds = array<i64: 1, 32, 32>}, {transform_indices = @transform_4, window_bounds = array<i64: 1, 16, 32>}, {pipeline_mode = #tpu.pipeline_mode<synchronous>, transform_indices = @transform_5, window_bounds = array<i64: 80, 64>}, {pipeline_mode = #tpu.pipeline_mode<synchronous>, transform_indices = @transform_6, window_bounds = array<i64: 80, 64>}, {pipeline_mode = #tpu.pipeline_mode<synchronous>, transform_indices = @transform_7, window_bounds = array<i64: 64, 64>}, {pipeline_mode = #tpu.pipeline_mode<synchronous>, transform_indices = @transform_8, window_bounds = array<i64: 64, 1>}, {transform_indices = @transform_9, window_bounds = array<i64: 1, 64, 32>}, {transform_indices = @transform_10, window_bounds = array<i64: 1, 1, 32>}, {transform_indices = @transform_11, window_bounds = array<i64: 1, 64, 2>}]} {
    %c0 = arith.constant 0 : index
    %c0_0 = arith.constant 0 : index
    %c0_1 = arith.constant 0 : index
    %0 = vector.load %arg1[%c0, %c0_0, %c0_1] : memref<1x64x32xbf16, #tpu.memory_space<vmem>>, vector<1x64x32xbf16>
    %1 = vector.shape_cast %0 : vector<1x64x32xbf16> to vector<64x32xbf16>
    %c0_2 = arith.constant 0 : index
    %c0_3 = arith.constant 0 : index
    %c0_4 = arith.constant 0 : index
    %2 = vector.load %arg2[%c0_2, %c0_3, %c0_4] : memref<1x64x32xbf16, #tpu.memory_space<vmem>>, vector<1x64x32xbf16>
    %3 = vector.shape_cast %2 : vector<1x64x32xbf16> to vector<64x32xbf16>
    %c0_5 = arith.constant 0 : index
    %c0_6 = arith.constant 0 : index
    %c0_7 = arith.constant 0 : index
    %4 = vector.load %arg3[%c0_5, %c0_6, %c0_7] : memref<1x32x16xf32, #tpu.memory_space<vmem>>, vector<1x32x16xf32>
    %5 = vector.shape_cast %4 : vector<1x32x16xf32> to vector<32x16xf32>
    %c0_8 = arith.constant 0 : index
    %c0_9 = arith.constant 0 : index
    %c0_10 = arith.constant 0 : index
    %6 = vector.load %arg4[%c0_8, %c0_9, %c0_10] : memref<1x32x32xf32, #tpu.memory_space<vmem>>, vector<1x32x32xf32>
    %7 = vector.shape_cast %6 : vector<1x32x32xf32> to vector<32x32xf32>
    %c0_11 = arith.constant 0 : index
    %c0_12 = arith.constant 0 : index
    %c0_13 = arith.constant 0 : index
    %8 = vector.load %arg5[%c0_11, %c0_12, %c0_13] : memref<1x16x32xf32, #tpu.memory_space<vmem>>, vector<1x16x32xf32>
    %9 = vector.shape_cast %8 : vector<1x16x32xf32> to vector<16x32xf32>
    %c0_14 = arith.constant 0 : index
    %c0_15 = arith.constant 0 : index
    %10 = vector.load %arg6[%c0_14, %c0_15] : memref<80x64xbf16, #tpu.memory_space<vmem>>, vector<80x64xbf16>
    %c0_16 = arith.constant 0 : index
    %c0_17 = arith.constant 0 : index
    %11 = vector.load %arg7[%c0_16, %c0_17] : memref<80x64xbf16, #tpu.memory_space<vmem>>, vector<80x64xbf16>
    %c0_18 = arith.constant 0 : index
    %c0_19 = arith.constant 0 : index
    %12 = vector.load %arg8[%c0_18, %c0_19] : memref<64x64xbf16, #tpu.memory_space<vmem>>, vector<64x64xbf16>
    %c0_20 = arith.constant 0 : index
    %c0_21 = arith.constant 0 : index
    %13 = vector.load %arg9[%c0_20, %c0_21] : memref<64x1xf32, #tpu.memory_space<vmem>>, vector<64x1xf32>
    %cst = arith.constant dense<0.000000e+00> : vector<80x32xf32>
    %14 = tpu.matmul %10, %1, %cst {dimension_numbers = #tpu.dot_dimension_numbers<[1], [0], [0], [1], [0, 0, 1, 1], [], []>} : vector<80x64xbf16>, vector<64x32xbf16>, vector<80x32xf32> -> vector<80x32xf32>
    %cst_22 = arith.constant dense<0.000000e+00> : vector<80x32xf32>
    %15 = tpu.matmul %11, %3, %cst_22 {dimension_numbers = #tpu.dot_dimension_numbers<[1], [0], [0], [1], [0, 0, 1, 1], [], []>} : vector<80x64xbf16>, vector<64x32xbf16>, vector<80x32xf32> -> vector<80x32xf32>
    %16 = vector.extract_strided_slice %14 {offsets = [0, 0], sizes = [16, 32], strides = [1, 1]} : vector<80x32xf32> to vector<16x32xf32>
    %17 = vector.extract_strided_slice %14 {offsets = [16, 0], sizes = [64, 32], strides = [1, 1]} : vector<80x32xf32> to vector<64x32xf32>
    %18 = vector.extract_strided_slice %15 {offsets = [0, 0], sizes = [16, 32], strides = [1, 1]} : vector<80x32xf32> to vector<16x32xf32>
    %19 = vector.extract_strided_slice %15 {offsets = [16, 0], sizes = [64, 32], strides = [1, 1]} : vector<80x32xf32> to vector<64x32xf32>
    %20 = arith.addf %16, %18 : vector<16x32xf32>
    %21 = arith.addf %20, %9 : vector<16x32xf32>
    %cst_23 = arith.constant dense<0.000000e+00> : vector<32x32xf32>
    %22 = tpu.matmul %5, %21, %cst_23 {dimension_numbers = #tpu.dot_dimension_numbers<[1], [0], [0], [1], [0, 0, 1, 1], [], []>} : vector<32x16xf32>, vector<16x32xf32>, vector<32x32xf32> -> vector<32x32xf32>
    %23 = arith.addf %22, %7 : vector<32x32xf32>
    %cst_24 = arith.constant dense<0xFF800000> : vector<32xf32>
    %24 = vector.multi_reduction <maximumf>, %23, %cst_24 [1] : vector<32x32xf32> to vector<32xf32>
    %25 = vector.shape_cast %24 : vector<32xf32> to vector<32x1xf32>
    %26 = vector.broadcast %25 : vector<32x1xf32> to vector<32x32xf32>
    %27 = arith.subf %23, %26 : vector<32x32xf32>
    %28 = math.exp %27 : vector<32x32xf32>
    %cst_25 = arith.constant dense<0.000000e+00> : vector<32xf32>
    %29 = vector.multi_reduction <add>, %28, %cst_25 [1] : vector<32x32xf32> to vector<32xf32>
    %30 = vector.shape_cast %29 : vector<32xf32> to vector<32x1xf32>
    %31 = vector.broadcast %30 : vector<32x1xf32> to vector<32x32xf32>
    %32 = arith.divf %28, %31 : vector<32x32xf32>
    %cst_26 = arith.constant 1.000000e+00 : f32
    %33 = vector.broadcast %cst_26 : f32 to vector<1x32xf32>
    %cst_27 = arith.constant dense<0.000000e+00> : vector<1x32xf32>
    %34 = tpu.matmul %33, %32, %cst_27 {dimension_numbers = #tpu.dot_dimension_numbers<[1], [0], [0], [1], [0, 0, 1, 1], [], []>} : vector<1x32xf32>, vector<32x32xf32>, vector<1x32xf32> -> vector<1x32xf32>
    %cst_28 = arith.constant 9.99999996E-13 : f32
    %35 = vector.broadcast %cst_28 : f32 to vector<1x32xf32>
    %36 = arith.addf %35, %34 : vector<1x32xf32>
    %37 = vector.broadcast %36 : vector<1x32xf32> to vector<32x32xf32>
    %38 = arith.divf %32, %37 : vector<32x32xf32>
    %39 = vector.extract_strided_slice %38 {offsets = [3, 0], sizes = [1, 32], strides = [1, 1]} : vector<32x32xf32> to vector<1x32xf32>
    %c0_29 = arith.constant 0 : index
    %c0_30 = arith.constant 0 : index
    %c0_31 = arith.constant 0 : index
    %40 = vector.load %arg11[%c0_29, %c0_30, %c0_31] : memref<1x1x32xf32, #tpu.memory_space<vmem>>, vector<1x1x32xf32>
    %41 = vector.shape_cast %40 : vector<1x1x32xf32> to vector<1x32xf32>
    %42 = vector.shape_cast %39 : vector<1x32xf32> to vector<1x1x32xf32>
    tpu.vector_store %arg11[%c0_29, %c0_30, %c0_31], %42 {strides = array<i32>} : memref<1x1x32xf32, #tpu.memory_space<vmem>>, vector<1x1x32xf32>,
    %43 = tpu.concatenate %17, %19 in 0 : vector<64x32xf32>, vector<64x32xf32> -> vector<128x32xf32>
    %44 = arith.truncf %43 : vector<128x32xf32> to vector<128x32xbf16>
    %45 = arith.truncf %38 : vector<32x32xf32> to vector<32x32xbf16>
    %cst_32 = arith.constant dense<0.000000e+00> : vector<128x32xf32>
    %46 = tpu.matmul %44, %45, %cst_32 {dimension_numbers = #tpu.dot_dimension_numbers<[1], [0], [0], [1], [0, 0, 1, 1], [], []>} : vector<128x32xbf16>, vector<32x32xbf16>, vector<128x32xf32> -> vector<128x32xf32>
    %47 = vector.extract_strided_slice %46 {offsets = [0, 0], sizes = [64, 32], strides = [1, 1]} : vector<128x32xf32> to vector<64x32xf32>
    %48 = vector.extract_strided_slice %46 {offsets = [64, 0], sizes = [64, 32], strides = [1, 1]} : vector<128x32xf32> to vector<64x32xf32>
    %49 = arith.addf %47, %48 : vector<64x32xf32>
    %cst_33 = arith.constant 5.000000e-01 : f32
    %50 = vector.broadcast %cst_33 : f32 to vector<64x32xf32>
    %51 = arith.mulf %50, %49 : vector<64x32xf32>
    %52 = arith.extf %1 : vector<64x32xbf16> to vector<64x32xf32>
    %53 = arith.subf %52, %51 : vector<64x32xf32>
    %54 = arith.truncf %53 : vector<64x32xf32> to vector<64x32xbf16>
    %cst_34 = arith.constant dense<0.000000e+00> : vector<64x32xf32>
    %55 = tpu.matmul %12, %54, %cst_34 {dimension_numbers = #tpu.dot_dimension_numbers<[1], [0], [0], [1], [0, 0, 1, 1], [], []>} : vector<64x64xbf16>, vector<64x32xbf16>, vector<64x32xf32> -> vector<64x32xf32>
    %56 = vector.broadcast %13 : vector<64x1xf32> to vector<64x32xf32>
    %57 = arith.addf %55, %56 : vector<64x32xf32>
    %c0_35 = arith.constant 0 : index
    %c0_36 = arith.constant 0 : index
    %c0_37 = arith.constant 0 : index
    %58 = vector.load %arg10[%c0_35, %c0_36, %c0_37] : memref<1x64x32xf32, #tpu.memory_space<vmem>>, vector<1x64x32xf32>
    %59 = vector.shape_cast %58 : vector<1x64x32xf32> to vector<64x32xf32>
    %60 = vector.shape_cast %57 : vector<64x32xf32> to vector<1x64x32xf32>
    tpu.vector_store %arg10[%c0_35, %c0_36, %c0_37], %60 {strides = array<i32>} : memref<1x64x32xf32, #tpu.memory_space<vmem>>, vector<1x64x32xf32>,
    %cst_38 = arith.constant dense<0.000000e+00> : vector<64xf32>
    %61 = vector.multi_reduction <add>, %57, %cst_38 [1] : vector<64x32xf32> to vector<64xf32>
    %62 = vector.shape_cast %61 : vector<64xf32> to vector<64x1xf32>
    %c0_39 = arith.constant 0 : index
    %c0_40 = arith.constant 0 : index
    %c0_41 = arith.constant 0 : index
    %63 = vector.load %arg12[%c0_39, %c0_40, %c0_41] : memref<1x64x2xf32, #tpu.memory_space<vmem>>, vector<1x64x1xf32>
    %64 = vector.shape_cast %63 : vector<1x64x1xf32> to vector<64x1xf32>
    %65 = vector.shape_cast %62 : vector<64x1xf32> to vector<1x64x1xf32>
    tpu.vector_store %arg12[%c0_39, %c0_40, %c0_41], %65 {strides = array<i32>} : memref<1x64x2xf32, #tpu.memory_space<vmem>>, vector<1x64x1xf32>,
    %66 = arith.mulf %57, %57 : vector<64x32xf32>
    %cst_42 = arith.constant dense<0.000000e+00> : vector<64xf32>
    %67 = vector.multi_reduction <add>, %66, %cst_42 [1] : vector<64x32xf32> to vector<64xf32>
    %68 = vector.shape_cast %67 : vector<64xf32> to vector<64x1xf32>
    %c0_43 = arith.constant 0 : index
    %c0_44 = arith.constant 0 : index
    %c1 = arith.constant 1 : index
    %69 = vector.load %arg12[%c0_43, %c0_44, %c1] : memref<1x64x2xf32, #tpu.memory_space<vmem>>, vector<1x64x1xf32>
    %70 = vector.shape_cast %69 : vector<1x64x1xf32> to vector<64x1xf32>
    %71 = vector.shape_cast %68 : vector<64x1xf32> to vector<1x64x1xf32>
    tpu.vector_store %arg12[%c0_43, %c0_44, %c1], %71 {strides = array<i32>} : memref<1x64x2xf32, #tpu.memory_space<vmem>>, vector<1x64x1xf32>,
    return
  }
  func.func @transform_0(%arg0: i32) -> (i32, i32, i32) {
    %c0_i32 = arith.constant 0 : i32
    %c0_i32_0 = arith.constant 0 : i32
    %c0_i32_1 = arith.constant 0 : i32
    return %arg0, %c0_i32, %c0_i32_0 : i32, i32, i32
  }
  func.func @transform_1(%arg0: i32) -> (i32, i32, i32) {
    %c0_i32 = arith.constant 0 : i32
    %c0_i32_0 = arith.constant 0 : i32
    %c0_i32_1 = arith.constant 0 : i32
    return %arg0, %c0_i32, %c0_i32_0 : i32, i32, i32
  }
  func.func @transform_2(%arg0: i32) -> (i32, i32, i32) {
    %c0_i32 = arith.constant 0 : i32
    %c0_i32_0 = arith.constant 0 : i32
    %c0_i32_1 = arith.constant 0 : i32
    return %arg0, %c0_i32, %c0_i32_0 : i32, i32, i32
  }
  func.func @transform_3(%arg0: i32) -> (i32, i32, i32) {
    %c0_i32 = arith.constant 0 : i32
    %c0_i32_0 = arith.constant 0 : i32
    %c0_i32_1 = arith.constant 0 : i32
    return %arg0, %c0_i32, %c0_i32_0 : i32, i32, i32
  }
  func.func @transform_4(%arg0: i32) -> (i32, i32, i32) {
    %c0_i32 = arith.constant 0 : i32
    %c0_i32_0 = arith.constant 0 : i32
    %c0_i32_1 = arith.constant 0 : i32
    return %arg0, %c0_i32, %c0_i32_0 : i32, i32, i32
  }
  func.func @transform_5(%arg0: i32) -> (i32, i32) {
    %c0_i32 = arith.constant 0 : i32
    %c0_i32_0 = arith.constant 0 : i32
    %c0_i32_1 = arith.constant 0 : i32
    return %c0_i32, %c0_i32_0 : i32, i32
  }
  func.func @transform_6(%arg0: i32) -> (i32, i32) {
    %c0_i32 = arith.constant 0 : i32
    %c0_i32_0 = arith.constant 0 : i32
    %c0_i32_1 = arith.constant 0 : i32
    return %c0_i32, %c0_i32_0 : i32, i32
  }
  func.func @transform_7(%arg0: i32) -> (i32, i32) {
    %c0_i32 = arith.constant 0 : i32
    %c0_i32_0 = arith.constant 0 : i32
    %c0_i32_1 = arith.constant 0 : i32
    return %c0_i32, %c0_i32_0 : i32, i32
  }
  func.func @transform_8(%arg0: i32) -> (i32, i32) {
    %c0_i32 = arith.constant 0 : i32
    %c0_i32_0 = arith.constant 0 : i32
    %c0_i32_1 = arith.constant 0 : i32
    return %c0_i32, %c0_i32_0 : i32, i32
  }
  func.func @transform_9(%arg0: i32) -> (i32, i32, i32) {
    %c0_i32 = arith.constant 0 : i32
    %c0_i32_0 = arith.constant 0 : i32
    %c0_i32_1 = arith.constant 0 : i32
    return %arg0, %c0_i32, %c0_i32_0 : i32, i32, i32
  }
  func.func @transform_10(%arg0: i32) -> (i32, i32, i32) {
    %c0_i32 = arith.constant 0 : i32
    %c0_i32_0 = arith.constant 0 : i32
    %c0_i32_1 = arith.constant 0 : i32
    return %arg0, %c0_i32, %c0_i32_0 : i32, i32, i32
  }
  func.func @transform_11(%arg0: i32) -> (i32, i32, i32) {
    %c0_i32 = arith.constant 0 : i32
    %c0_i32_0 = arith.constant 0 : i32
    %c0_i32_1 = arith.constant 0 : i32
    return %arg0, %c0_i32, %c0_i32_0 : i32, i32, i32
  }
}

</mosaic_0001>

<bundles_post_ra>
// kernel: tpu_custom_call.1
= control target key start
LH: loop header
LB: loop body
LE: loop exit
PB: predicated region body
PF: predicated region fallthrough
CT: control target
= control target key end

     0   :  { %s2497_s0 = inlined_call_operand.vmem [shape: bf16[2,64,32], index: 0, kind: input, shape index: {}]   ;;  %s2498_s1 = inlined_call_operand.vmem [shape: bf16[2,64,32], index: 1, kind: input, shape index: {}]   ;;  %s2499_s2 = inlined_call_operand.vmem [shape: f32[2,32,16], index: 2, kind: input, shape index: {}]   ;;  %s2500_s3 = inlined_call_operand.vmem [shape: f32[2,32,32], index: 3, kind: input, shape index: {}]   ;;  %s2501_s4 = inlined_call_operand.vmem [shape: f32[2,16,32], index: 4, kind: input, shape index: {}]   ;;  %s2502_s5 = inlined_call_operand.vmem [shape: bf16[80,64], index: 5, kind: input, shape index: {}]   ;;  %s2503_s6 = inlined_call_operand.vmem [shape: bf16[80,64], index: 6, kind: input, shape index: {}]   ;;  %s2504_s7 = inlined_call_operand.vmem [shape: bf16[64,64], index: 7, kind: input, shape index: {}]   ;;  %s2505_s8 = inlined_call_operand.vmem [shape: f32[64,1], index: 8, kind: input, shape index: {}]   ;;  %s2506_s9 = inlined_call_operand.vmem [shape: f32[2,64,32], index: 9, kind: output, shape index: {0}]   ;;  %s2507_s10 = inlined_call_operand.hbm [shape: f32[2,1,32], index: 10, kind: output, shape index: {1}]   ;;  %s2508_s11 = inlined_call_operand.vmem [shape: f32[2,64,2], index: 11, kind: output, shape index: {2}]  }
   0x1   :  { %2511 = sst [smem:[#allocation5_spill]] %s2497_s0 }
   0x2   :  { %2512 = sst [smem:[#allocation6_spill]] %s2498_s1 }
   0x3   :  { %2513 = sst [smem:[#allocation7_spill]] %s2499_s2 }
   0x4   :  { %17 = vsyncpa [#allocation3], 0 }
   0x5   :  { %19 = vsyncpa [#allocation3 + $0x1], 0  ;;  %s2101_s17 = smov 0   ;;  %s2103_s18 = smov 0  }
   0x6   :  { %s2105_s19 = smov 0   ;;  %s2107_s20 = smov 0  }
   0x7 LB: > { %s2122_s21 = sadd.s32 4294967295, %s2033_s20   ;;  %s1626_s22 = sadd.s32 4294967294, %s2033_s20   ;;  %s2033_s20 = sphi %s2107_s20, %s2524_s20   ;;  %s2029_s19 = sphi %s2105_s19, %s2523_s19   ;;  %s2025_s18 = sphi %s2103_s18, %s2522_s18   ;;  %s2021_s17 = sphi %s2101_s17, %s2521_s17  }
   0x8   : > { %s2126_s23 = sadd.s32 1, %s2033_s20   ;;  %s272_s24 = sadd.s32 1, %s2029_s19 }
   0x9   : > { %s269_s25 = ssub.s32 %s2033_s20, %s2126_s23  ;;  %p282_p0 = scmp.ne.s32.totalorder %s2029_s19, %s2025_s18 }
   0xa   : > { %p270_p1 = scmp.eq.s32.totalorder %s269_s25, 0  ;;  %p283_p2 = scmp.eq.s32.totalorder %s2122_s21, 1 }
   0xb   : > { %p288_p3 = scmp.ne.s32.totalorder %s2025_s18, %s2021_s17  ;;  %p289_p4 = scmp.eq.s32.totalorder %s1626_s22, 1 }
   0xc   : > { %s2137_s26 = scalar_select %p270_p1, %s2029_s19, %s272_s24  }
   0xd   : > { %p2139_p5 = por %p283_p2, %p282_p0  ;;  %p2143_p6 = por %p289_p4, %p288_p3 }
   0xe   : > { %p1629_p7 = scmp.ge.s32.totalorder %s2033_s20, 1  ;;  %p385_p8 = scmp.lt.s32.totalorder %s2033_s20, 3 }
  0x10   : > { %p386_p9 = pnand %p1629_p7, %p385_p8 }
  0x11   : > { %p454_p10 = scmp.lt.s32.totalorder (!%p386_p9), %s2122_s21, 1  ;;  %v2035_v0 = vmov (!%p386_p9), 0.0   ;;  %vm2036_vm0 = vmmov (!%p386_p9), 0   ;;  %s2516_s0 = sld [smem:[#allocation5_spill]] (!%p386_p9)  ;;  %v1935_v9 = vld [vmem:[%s2502_s5] sm:$0xff] (!%p386_p9)   ;;  %vm601_vm1 = vcmask (!%p386_p9), 523264  }
  0x12   : > { %389 = sbr.rel (%p386_p9) target bundleno = 1692 (0x69c), region = 56  ;;  %1750 = vmatprep.subr.bf16.mxu0 (!%p386_p9), %v2035_v0  ;;  %1778 = vmatprep.subr.bf16.mxu1 (!%p386_p9), %v2035_v0  ;;  %s2517_s1 = sld [smem:[#allocation6_spill]] (!%p386_p9)  ;;  %v1936_v10 = vld [vmem:[%s2503_s6] sm:$0xff] (!%p386_p9)   ;;  %v1937_v11 = vld [vmem:[%s2502_s5 + $0x8] sm:$0xff] (!%p386_p9)   ;;  %v1938_v12 = vld [vmem:[%s2502_s5 + $0x10] sm:$0xff] (!%p386_p9)   ;;  %vm831_vm2 = vcmask (!%p386_p9), 130048  }
  0x13   : > { %1758 = vmatprep.mubr.msk.bf16.mxu0 (!%p386_p9), %vm2036_vm0, %v2035_v0  ;;  %1786 = vmatprep.mubr.msk.bf16.mxu1 (!%p386_p9), %vm2036_vm0, %v2035_v0  ;;  %v1939_v13 = vld [vmem:[%s2502_s5 + $0x18] sm:$0xff] (!%p386_p9)   ;;  %v1940_v14 = vld [vmem:[%s2502_s5 + $0x20] sm:$0xff] (!%p386_p9)   ;;  %s2518_s2 = sld [smem:[#allocation7_spill]] (!%p386_p9)  ;;  %vm929_vm3 = vcmask (!%p386_p9), 261120   ;;  %s2509_s12 = sand.u32 (!%p386_p9), 1, %s2025_s18   ;;  %vm1056_vm4 = vcmask (!%p386_p9), 257027  }
  0x19   : > { %s2153_s29 = scalar_select %p454_p10, %s2122_s21, 1 }
  0x1b   : > { %s2160_s30 = sshll.u32 %s2153_s29, 5 }
  0x1c   : > { %s458_s14 = scalar_lea.vmem %s2516_s0, %s2160_s30  ;;  %s463_s22 = scalar_lea.vmem %s2517_s1, %s2160_s30 }
  0x1d   : > { %v2170_v1 = vld [vmem:[%s458_s14] sm:$0xff]   ;;  %v2172_v3 = vld [vmem:[%s458_s14 + $0x8] sm:$0xff]   ;;  %v2177_v5 = vld [vmem:[%s458_s14 + $0x10] sm:$0xff]   ;;  %s2226_s16 = scalar_lea.vmem %s2518_s2, %s2160_s30  ;;  %s473_s13 = scalar_lea.vmem %s2500_s3, %s2160_s30 }
  0x1e   : > { %v1928_v2 = vld [vmem:[%s463_s22] sm:$0xff]   ;;  %1751 = vmatpush3.bf16.msra.mxu0 %v2170_v1  ;;  %v1930_v4 = vld [vmem:[%s463_s22 + $0x8] sm:$0xff]   ;;  %v1932_v6 = vld [vmem:[%s463_s22 + $0x10] sm:$0xff]   ;;  %s1693_s1 = sshll.u32 %s2122_s21, 4 }
  0x1f   : > { %1779 = vmatpush3.bf16.msra.mxu1 %v1928_v2  ;;  %1752 = vmatprep.subr.bf16.mxu0 %v2035_v0  ;;  %v2179_v7 = vld [vmem:[%s458_s14 + $0x18] sm:$0xff]   ;;  %v506_v15 = vld [vmem:[%s2226_s16] sm:$0xff]  ;;  %v507_v33 = vld [vmem:[%s2226_s16 + $0x8] sm:$0xff]  ;;  %s2420_s15 = scalar_lea.hbm %s2507_s10, %s1693_s1 }
  0x20   : > { %1780 = vmatprep.subr.bf16.mxu1 %v2035_v0  ;;  %v1934_v8 = vld [vmem:[%s463_s22 + $0x18] sm:$0xff]   ;;  %s1700_s22 = sshll.u32 %s2153_s29, 4  ;;  %v508_v35 = vld [vmem:[%s2226_s16 + $0x10] sm:$0xff]  ;;  %v510_v54 = vld [vmem:[%s473_s13] sm:$0xff] }
  0x21   : > { %s478_s0 = scalar_lea.vmem %s2501_s4, %s1700_s22  ;;  %v509_v38 = vld [vmem:[%s2226_s16 + $0x18] sm:$0xff]  ;;  %v511_v56 = vld [vmem:[%s473_s13 + $0x8] sm:$0xff]  ;;  %v512_v59 = vld [vmem:[%s473_s13 + $0x10] sm:$0xff]  ;;  %s2510_s22 = sshll.u32 %s2153_s29, 6 }
  0x22   : > { %1753 = vmatpush3.bf16.msra.mxu0 %v2172_v3  ;;  %v514_v21 = vld [vmem:[%s478_s0] sm:$0xff]  ;;  %v515_v23 = vld [vmem:[%s478_s0 + $0x8] sm:$0xff]  ;;  %v513_v63 = vld [vmem:[%s473_s13 + $0x18] sm:$0xff]  ;;  %s2305_s13 = scalar_lea.vmem [#allocation2], %s2509_s12  ;;  %s2381_s0 = scalar_lea.vmem %s2506_s9, %s2510_s22 }
  0x23   : > { %1781 = vmatpush3.bf16.msra.mxu1 %v1930_v4  ;;  %1754 = vmatprep.subr.bf16.mxu0 %v2035_v0  ;;  %s1470_s12 = sshll.u32 %s2305_s13, 4  ;;  %s2519_s16 = sand.u32 1, %s2025_s18   ;;  %s1471_s12 = int_to_ptr.vmem [resolvable:$true] %s1470_s12 }
  0x24   : > { %1782 = vmatprep.subr.bf16.mxu1 %v2035_v0  ;;  %s1450_s24 = scalar_lea.sflag [#allocation3], %s2519_s16  ;;  %s1971_s25 = scalar_lea.vmem %s1471_s12, 16 }
  0x25   : > { %p1972_p11 = scmp.ne.s32.totalorder %s1471_s12, %s1971_s25 }
  0x26   : > { %1755 = vmatpush3.bf16.msra.mxu0 %v2177_v5 }
  0x27   : > { %1783 = vmatpush3.bf16.msra.mxu1 %v1932_v6  ;;  %1756 = vmatprep.subr.bf16.mxu0 %v2035_v0  ;;  %p1973_p12 = pnand %p1972_p11, %p2139_p5 }
  0x28   : > { %1784 = vmatprep.subr.bf16.mxu1 %v2035_v0 }
  0x29   : > { %p1974_p13 = pneg %p1973_p12 }
  0x2a   : > { %1757 = vmatpush3.bf16.msra.mxu0 %v2179_v7 }
  0x2b   : > { %1785 = vmatpush3.bf16.msra.mxu1 %v1934_v8 }
  0x2d   : > { %1759 = vmatmul.mubr.msk.bf16.vlgmr.msra.gmra.mrb[0].mxu0 %vm601_vm1, %v1935_v9 }
  0x2e   : > { %1787 = vmatmul.mubr.msk.bf16.vlgmr.msra.gmra.mrb[0].mxu1 %vm601_vm1, %v1936_v10  ;;  %1762 = vmatprep.mubr.msk.bf16.mxu0 %vm2036_vm0, %v2035_v0 }
  0x2f   : > { %1790 = vmatprep.mubr.msk.bf16.mxu1 %vm2036_vm0, %v2035_v0 }
  0x35   : > { %1763 = vmatmul.mubr.msk.bf16.gmra.mrb[4].mxu0 %vm601_vm1, %v1937_v11  ;;  %v1941_v11 = vld [vmem:[%s2503_s6 + $0x8] sm:$0xff]  }
  0x36   : > { %1766 = vmatprep.mubr.msk.bf16.mxu0 %vm2036_vm0, %v2035_v0  ;;  %1791 = vmatmul.mubr.msk.bf16.gmra.mrb[4].mxu1 %vm601_vm1, %v1941_v11 }
  0x37   : > { %1794 = vmatprep.mubr.msk.bf16.mxu1 %vm2036_vm0, %v2035_v0 }
  0x3d   : > { %1767 = vmatmul.mubr.msk.bf16.gmra.mrb[8].mxu0 %vm601_vm1, %v1938_v12 }
  0x3e   : > { %1770 = vmatprep.mubr.msk.bf16.mxu0 %vm2036_vm0, %v2035_v0 }
  0x45   : > { %1771 = vmatmul.mubr.msk.bf16.gmra.mrb[12].mxu0 %vm601_vm1, %v1939_v13 }
  0x46   : > { %1774 = vmatprep.mubr.msk.bf16.mxu0 %vm2036_vm0, %v2035_v0 }
  0x4d   : > { %1775 = vmatmul.mubr.msk.bf16.gmra.mrb[16].mxu0 %vm601_vm1, %v1940_v14 }
  0x4e   : > { %1810 = vmatprep.mubr.msk.f32.mxu0 %vm831_vm2, %v506_v15 }
 0x100   : > { %v651_v16 = vpop.f32.mrb[0].mxu0 }
 0x101   : > { %v788_v17 = vpop.f32.mrb[0].mxu1  ;;  %v1760_v19 = vpop.f32.mrb[1].mxu0 }
 0x102   : > { %v827_v18 = vadd.f32 %v788_v17, %v651_v16  ;;  %v1788_v20 = vpop.f32.mrb[1].mxu1  ;;  %v654_v22 = vpop.f32.mrb[2].mxu0 }
 0x103   : > { %v791_v24 = vpop.f32.mrb[2].mxu1  ;;  %v1761_v26 = vpop.f32.mrb[3].mxu0 }
 0x104   : > { %v828_v25 = vadd.f32 %v791_v24, %v654_v22  ;;  %v1789_v27 = vpop.f32.mrb[3].mxu1  ;;  %v829_v28 = vadd.f32 %v827_v18, %v514_v21 }
 0x106   : > { %v830_v29 = vadd.f32 %v828_v25, %v515_v23 }
 0x108   : > { %v1863_v30 = vpack.c.bf16 %v830_v29, %v829_v28  ;;  %v659_v31 = vpop.f32.mrb[4].mxu0 }
 0x109   : > { %v1764_v32 = vpop.f32.mrb[5].mxu0 }
 0x10a   : > { %1864 = vmatprep.subr.bf16.mxu0 %v1863_v30  ;;  %v662_v34 = vpop.f32.mrb[6].mxu0  ;;  %v1942_v32 = vld [vmem:[%s2503_s6 + $0x10] sm:$0xff]  }
 0x10b   : > { %1866 = vmatpush3.bf16.msra.mxu0 %v1863_v30  ;;  %v1058_v36 = vpack.c.bf16 %v662_v34, %v659_v31  ;;  %v1765_v37 = vpop.f32.mrb[7].mxu0  ;;  %1795 = vmatmul.mubr.msk.bf16.gmra.mrb[8].mxu1 %vm601_vm1, %v1942_v32  ;;  %v2037_v34 = vmov 0.0|0.0  }
 0x10c   : > { %1798 = vmatprep.mubr.msk.bf16.mxu1 %vm2036_vm0, %v2035_v0  ;;  %1867 = vmatprep.subr.bf16.mxu1 %v2037_v34 }
 0x10e   : > { %1811 = vmatmul.mubr.msk.f32.vlgmr.msra.gmra.mrb[20].mxu0 %vm831_vm2, %v507_v33  ;;  %v1943_v33 = vld [vmem:[%s2503_s6 + $0x18] sm:$0xff]  }
 0x10f   : > { %1813 = vmatprep.mubr.msk.f32.mxu0 %vm831_vm2, %v508_v35  ;;  %v1944_v35 = vld [vmem:[%s2503_s6 + $0x20] sm:$0xff]  }
 0x110   : > { %v2239_v39 = vpop.f32.mrb[8].mxu0 }
 0x111   : > { %v1768_v40 = vpop.f32.mrb[9].mxu0 }
 0x112   : > { %1814 = vmatmul.mubr.msk.f32.gmra.mrb[22].mxu0 %vm831_vm2, %v509_v38  ;;  %v2243_v41 = vpop.f32.mrb[10].mxu0 }
 0x113   : > { %1831 = vmatprep.mubr.msk.bf16.mxu0 %vm929_vm3, %v1058_v36  ;;  %v1059_v42 = vpack.c.bf16 %v2243_v41, %v2239_v39  ;;  %v1769_v43 = vpop.f32.mrb[11].mxu0  ;;  %1799 = vmatmul.mubr.msk.bf16.gmra.mrb[12].mxu1 %vm601_vm1, %v1943_v33  ;;  %v2295_v36 = vpop.f32.mrb[4].mxu1  ;;  %v1945_v39 = vld [vmem:[%s2504_s7] sm:$0xff]   ;;  %v545_v41 = vld [vmem:[%s2505_s8 + $0x8] sm:$0xff] }
 0x114   : > { %1802 = vmatprep.mubr.msk.bf16.mxu1 %vm2036_vm0, %v2035_v0  ;;  %v1792_v37 = vpop.f32.mrb[5].mxu1 }
 0x115   : > { %v2297_v38 = vpop.f32.mrb[6].mxu1 }
 0x116   : > { %v1062_v40 = vpack.c.bf16 %v2297_v38, %v2295_v36  ;;  %v1793_v43 = vpop.f32.mrb[7].mxu1  ;;  %v1207_v38 = vunpack.c.l.bf16 %v2172_v3 }
 0x117   : > { %v1208_v43 = vunpack.c.h.bf16 %v2172_v3  ;;  %v1212_v3 = vunpack.c.h.bf16 %v2179_v7 }
 0x118   : > { %v2247_v44 = vpop.f32.mrb[12].mxu0 }
 0x119   : > { %v1772_v45 = vpop.f32.mrb[13].mxu0 }
 0x11a   : > { %v2249_v46 = vpop.f32.mrb[14].mxu0 }
 0x11b   : > { %v1060_v47 = vpack.c.bf16 %v2249_v46, %v2247_v44  ;;  %v1773_v48 = vpop.f32.mrb[15].mxu0  ;;  %1803 = vmatmul.mubr.msk.bf16.gmra.mrb[16].mxu1 %vm601_vm1, %v1944_v35  ;;  %v2039_v44 = vmov 0   ;;  %v546_v46 = vld [vmem:[%s2505_s8 + $0x10] sm:$0xff]  ;;  %v1205_v35 = vunpack.c.l.bf16 %v2170_v1 }
 0x11c   : > { %1824 = vmatprep.mubr.msk.f32.mxu1 %vm2036_vm0, %v2035_v0  ;;  %1926 = vset.pattern.permute.xlu1 %v2039_v44 }
 0x11d   : > { %1925 = vset.pattern.permute.xlu0 %v2039_v44 }
 0x120   : > { %v2253_v49 = vpop.f32.mrb[16].mxu0 }
 0x121   : > { %v1776_v50 = vpop.f32.mrb[17].mxu0 }
 0x122   : > { %v2255_v51 = vpop.f32.mrb[18].mxu0 }
 0x123   : > { %v1061_v52 = vpack.c.bf16 %v2255_v51, %v2253_v49  ;;  %v1777_v53 = vpop.f32.mrb[19].mxu0  ;;  %v548_v49 = vld [vmem:[%s2505_s8 + $0x20] sm:$0xff]  ;;  %v549_v51 = vld [vmem:[%s2505_s8 + $0x28] sm:$0xff] }
 0x1e1   : > { %v1812_v55 = vpop.f32.mrb[20].mxu0 }
 0x1e2   : > { %v910_v57 = vpop.f32.mrb[21].mxu0  ;;  %v916_v60 = vadd.f32 %v1812_v55, %v511_v56 }
 0x1e3   : > { %v911_v58 = vadd.f32 %v910_v57, %v510_v54 }
 0x1e4   : > { %v933_v9 = vsel %vm929_vm3, %v916_v60, -inf }
 0x1e5   : > { %v1815_v61 = vpop.f32.mrb[22].mxu0  ;;  %v930_v62 = vsel %vm929_vm3, %v911_v58, -inf }
 0x1e6   : > { %v920_v2 = vpop.f32.mrb[23].mxu0  ;;  %931 = vmax.xlane.f32.xlu0 %v930_v62  ;;  %v926_v6 = vadd.f32 %v1815_v61, %v513_v63  ;;  %v2038_v63 = vmov 1.0  }
 0x1e7   : > { %v921_v4 = vadd.f32 %v920_v2, %v512_v59  ;;  %v804_v2 = vpop.f32.mrb[8].mxu1 }
 0x1e8   : > { %v939_v10 = vsel %vm929_vm3, %v926_v6, -inf }
 0x1e9   : > { %v936_v8 = vsel %vm929_vm3, %v921_v4, -inf }
 0x1ea   : > { %937 = vmax.xlane.f32.xlu1 %v936_v8  ;;  %934 = vmax.xlane.f32.xlu0 %v933_v9 }
 0x1ee   : > { %940 = vmax.xlane.f32.xlu1 %v939_v10 }
 0x273   : > { %v932_v12 = vpop.xlane.xlu0 %931 }
 0x274   : > { %v942_v13 = vsub.f32 %v911_v58, %v932_v12 }
 0x276   : > { %v946_v14 = vmul.f32 1.442695, %v942_v13 }
 0x277   : > { %v938_v15 = vpop.xlane.xlu1 %937  ;;  %v935_v16 = vpop.xlane.xlu0 %934 }
 0x278   : > { %1953 = vpow2.f32 %v946_v14  ;;  %v944_v17 = vsub.f32 %v921_v4, %v938_v15  ;;  %v943_v18 = vsub.f32 %v916_v60, %v935_v16  ;;  %v1796_v4 = vpop.f32.mrb[9].mxu1 }
 0x27a   : > { %v950_v19 = vmul.f32 1.442695, %v944_v17  ;;  %v948_v20 = vmul.f32 1.442695, %v943_v18 }
 0x27b   : > { %v941_v21 = vpop.xlane.xlu1 %940 }
 0x27c   : > { %1955 = vpow2.f32 %v950_v19  ;;  %v945_v22 = vsub.f32 %v926_v6, %v941_v21  ;;  %v807_v6 = vpop.f32.mrb[10].mxu1 }
 0x27d   : > { %1957 = vpow2.f32 %v948_v20  ;;  %v1063_v8 = vpack.c.bf16 %v807_v6, %v804_v2  ;;  %v1797_v9 = vpop.f32.mrb[11].mxu1  ;;  %v1047_v20 = vlaneseq }
 0x27e   : > { %v952_v23 = vmul.f32 1.442695, %v945_v22  ;;  %v812_v10 = vpop.f32.mrb[12].mxu1 }
 0x27f   : > { %v1800_v11 = vpop.f32.mrb[13].mxu1  ;;  %v1048_v21 = vshrl.u32 %v1047_v20, 7 }
 0x280   : > { %1959 = vpow2.f32 %v952_v23  ;;  %v815_v12 = vpop.f32.mrb[14].mxu1 }
 0x281   : > { %v1064_v13 = vpack.c.bf16 %v815_v12, %v812_v10  ;;  %v1801_v14 = vpop.f32.mrb[15].mxu1  ;;  %v1049_v22 = vsub.s32 0, %v1048_v21 }
 0x282   : > { %v1954_v24 = vpop.eup %1953  ;;  %v820_v15 = vpop.f32.mrb[16].mxu1 }
 0x283   : > { %v954_v25 = vsel %vm929_vm3, %v1954_v24, 0.0  ;;  %v1804_v16 = vpop.f32.mrb[17].mxu1 }
 0x284   : > { %955 = vadd.xlane.f32.xlu0 %v954_v25  ;;  %v823_v17 = vpop.f32.mrb[18].mxu1 }
 0x285   : > { %v1065_v18 = vpack.c.bf16 %v823_v17, %v820_v15  ;;  %v1805_v19 = vpop.f32.mrb[19].mxu1  ;;  %v1947_v17 = vld [vmem:[%s2504_s7 + $0x10] sm:$0xff]  }
 0x286   : > { %v1956_v26 = vpop.eup %1955 }
 0x287   : > { %v1958_v27 = vpop.eup %1957  ;;  %v960_v28 = vsel %vm929_vm3, %v1956_v26, 0.0 }
 0x288   : > { %961 = vadd.xlane.f32.xlu0 %v960_v28  ;;  %v957_v29 = vsel %vm929_vm3, %v1958_v27, 0.0 }
 0x289   : > { %958 = vadd.xlane.f32.xlu1 %v957_v29 }
 0x28a   : > { %v1960_v30 = vpop.eup %1959 }
 0x28b   : > { %v963_v31 = vsel %vm929_vm3, %v1960_v30, 0.0 }
 0x28d   : > { %964 = vadd.xlane.f32.xlu1 %v963_v31 }
 0x29e   : > { %1232 = vperm.xlu1 %1926, %v545_v41  }
 0x2a2   : > { %1237 = vperm.xlu1 %1926, %v546_v46  }
 0x311   : > { %v956_v45 = vpop.xlane.xlu0 %955 }
 0x312   : > { %1961 = vrcp.f32 %v956_v45  ;;  %v1206_v45 = vunpack.c.h.bf16 %v2170_v1  ;;  %v1209_v1 = vunpack.c.l.bf16 %v2177_v5 }
 0x315   : > { %v962_v50 = vpop.xlane.xlu0 %961 }
 0x316   : > { %v959_v48 = vpop.xlane.xlu1 %958 }
 0x317   : > { %1963 = vrcp.f32 %v959_v48 }
 0x318   : > { %1965 = vrcp.f32 %v962_v50 }
 0x31a   : > { %v965_v53 = vpop.xlane.xlu1 %964 }
 0x31b   : > { %1967 = vrcp.f32 %v965_v53 }
 0x31c   : > { %v1962_v54 = vpop.eup %1961 }
 0x31d   : > { %v967_v0 = vmul.f32 %v1962_v54, %v1954_v24 }
 0x31e   : > { %v1233_v19 = vpop.permute.xlu1 %1232 }
 0x321   : > { %v1964_v55 = vpop.eup %1963 }
 0x322   : > { %v969_v56 = vmul.f32 %v1964_v55, %v1958_v27  ;;  %v1966_v57 = vpop.eup %1965  ;;  %v1238_v20 = vpop.permute.xlu1 %1237 }
 0x323   : > { %v971_v60 = vmul.f32 %v1966_v57, %v1956_v26 }
 0x324   : > { %v1868_v58 = vpack.c.bf16 %v969_v56, %v967_v0 }
 0x325   : > { %v1968_v59 = vpop.eup %1967 }
 0x326   : > { %1869 = vmatpush3.bf16.msra.mxu1 %v1868_v58  ;;  %v973_v61 = vmul.f32 %v1968_v59, %v1960_v30 }
 0x327   : > { %1870 = vmatprep.subr.bf16.mxu1 %v2037_v34  ;;  %v551_v34 = vld [vmem:[%s2505_s8 + $0x38] sm:$0xff] }
 0x328   : > { %v1871_v62 = vpack.c.bf16 %v973_v61, %v971_v60 }
 0x32a   : > { %1872 = vmatpush3.bf16.msra.mxu1 %v1871_v62 }
 0x32d   : > { %1825 = vmatmul.mubr.msk.f32.vlgmr.msra.gmra.mrb[20].mxu1 %vm929_vm3, %v2038_v63  ;;  %v1211_v63 = vunpack.c.l.bf16 %v2179_v7 }
 0x32e   : > { %1855 = vmatprep.mubr.msk.bf16.mxu1 %vm601_vm1, %v1945_v39 }
 0x400   : > { %v1043_v23 = vpop.f32.mrb[20].mxu1 }
 0x401   : > { %v1044_v24 = vadd.f32 1e-12, %v1043_v23  ;;  %v1826_v25 = vpop.f32.mrb[21].mxu1 }
 0x403   : > { %v1050_v26 = vrot.slane %v1044_v24, %v1049_v22 }
 0x405   : > { %1969 = vrcp.f32 %v1050_v26 }
 0x40f   : > { %v1970_v27 = vpop.eup %1969 }
 0x410   : > { %v1052_v28 = vmul.f32 %v1970_v27, %v967_v0  ;;  %v1053_v29 = vmul.f32 %v1970_v27, %v969_v56  ;;  %v1054_v30 = vmul.f32 %v1970_v27, %v971_v60  ;;  %v1055_v31 = vmul.f32 %v1970_v27, %v973_v61 }
 0x412   : > { %v1066_v32 = vpack.c.bf16 %v1053_v29, %v1052_v28  ;;  %1057 = vst.msk [vmem:[%s2305_s13 - $0x3] sm:$0x8] %vm1056_vm4, %v1052_v28  ;;  %v1067_v33 = vpack.c.bf16 %v1055_v31, %v1054_v30 }
 0x414   : > { %1827 = vmatprep.subr.bf16.mxu0 %v1066_v32 }
 0x415   : > { %1828 = vmatpush3.bf16.msra.mxu0 %v1066_v32 }
 0x416   : > { %1829 = vmatprep.subr.bf16.mxu0 %v1067_v33 }
 0x419   : > { %1830 = vmatpush3.bf16.msra.mxu0 %v1067_v33 }
 0x41c   : > { %1832 = vmatmul.mubr.msk.bf16.vlgmr.msra.gmra.mrb[24].mxu0 %vm929_vm3, %v1059_v42  ;;  %v544_v42 = vld [vmem:[%s2505_s8] sm:$0xff] }
 0x41d   : > { %1835 = vmatprep.mubr.msk.bf16.mxu0 %vm929_vm3, %v1060_v47  ;;  %1227 = vperm.xlu0 %1925, %v544_v42   ;;  %v547_v47 = vld [vmem:[%s2505_s8 + $0x18] sm:$0xff] }
 0x41e   : > { %1242 = vperm.xlu1 %1926, %v547_v47  }
 0x422   : > { %1247 = vperm.xlu1 %1926, %v548_v49  }
 0x424   : > { %1836 = vmatmul.mubr.msk.bf16.gmra.mrb[28].mxu0 %vm929_vm3, %v1061_v52  ;;  %v550_v52 = vld [vmem:[%s2505_s8 + $0x30] sm:$0xff] }
 0x425   : > { %1839 = vmatprep.mubr.msk.bf16.mxu0 %vm929_vm3, %v1062_v40 }
 0x426   : > { %1252 = vperm.xlu1 %1926, %v549_v51  }
 0x42a   : > { %1257 = vperm.xlu1 %1926, %v550_v52  }
 0x42c   : > { %1840 = vmatmul.mubr.msk.bf16.gmra.mrb[24].mxu0 %vm929_vm3, %v1063_v8  ;;  %v1210_v8 = vunpack.c.h.bf16 %v2177_v5  ;;  %v1946_v5 = vld [vmem:[%s2504_s7 + $0x8] sm:$0xff]  }
 0x42d   : > { %1843 = vmatprep.mubr.msk.bf16.mxu0 %vm929_vm3, %v1064_v13 }
 0x42e   : > { %1262 = vperm.xlu1 %1926, %v551_v34  }
 0x434   : > { %1844 = vmatmul.mubr.msk.bf16.gmra.mrb[28].mxu0 %vm929_vm3, %v1065_v18  ;;  %v1948_v18 = vld [vmem:[%s2504_s7 + $0x18] sm:$0xff]  }
 0x49c   : > { %v1228_v24 = vpop.permute.xlu0 %1227 }
 0x49d   : > { %v1243_v21 = vpop.permute.xlu1 %1242 }
 0x4a1   : > { %v1248_v22 = vpop.permute.xlu1 %1247 }
 0x4a5   : > { %v1253_v23 = vpop.permute.xlu1 %1252 }
 0x4a9   : > { %v1258_v42 = vpop.permute.xlu1 %1257 }
 0x4ff   : > { %v1841_v36 = vpop.f32.mrb[24].mxu0 }
 0x500   : > { %v1199_v37 = vmul.f32 0.5, %v1841_v36  ;;  %v1158_v40 = vpop.f32.mrb[25].mxu0 }
 0x501   : > { %v1197_v48 = vmul.f32 0.5, %v1158_v40  ;;  %v1842_v50 = vpop.f32.mrb[26].mxu0 }
 0x502   : > { %v1200_v53 = vmul.f32 0.5, %v1842_v50  ;;  %v1161_v54 = vpop.f32.mrb[27].mxu0  ;;  %v1215_v56 = vsub.f32 %v1207_v38, %v1199_v37 }
 0x503   : > { %v1213_v55 = vsub.f32 %v1205_v35, %v1197_v48  ;;  %v1198_v0 = vmul.f32 0.5, %v1161_v54  ;;  %v1263_v35 = vpop.permute.xlu1 %1262 }
 0x504   : > { %v1216_v57 = vsub.f32 %v1208_v43, %v1200_v53 }
 0x505   : > { %v1214_v58 = vsub.f32 %v1206_v45, %v1198_v0 }
 0x506   : > { %v1222_v59 = vpack.c.bf16 %v1216_v57, %v1215_v56 }
 0x507   : > { %v1845_v60 = vpop.f32.mrb[28].mxu0  ;;  %v1221_v61 = vpack.c.bf16 %v1214_v58, %v1213_v55 }
 0x508   : > { %v1203_v62 = vmul.f32 0.5, %v1845_v60  ;;  %v1174_v2 = vpop.f32.mrb[29].mxu0 }
 0x509   : > { %v1201_v4 = vmul.f32 0.5, %v1174_v2  ;;  %v1846_v6 = vpop.f32.mrb[30].mxu0  ;;  %1847 = vmatprep.subr.bf16.mxu1 %v1221_v61 }
 0x50a   : > { %v1204_v9 = vmul.f32 0.5, %v1846_v6  ;;  %v1177_v10 = vpop.f32.mrb[31].mxu0  ;;  %1848 = vmatpush3.bf16.msra.mxu1 %v1221_v61  ;;  %v1219_v12 = vsub.f32 %v1211_v63, %v1203_v62 }
 0x50b   : > { %v1202_v11 = vmul.f32 0.5, %v1177_v10  ;;  %1849 = vmatprep.subr.bf16.mxu1 %v1222_v59  ;;  %v1217_v14 = vsub.f32 %v1209_v1, %v1201_v4 }
 0x50c   : > { %v1220_v13 = vsub.f32 %v1212_v3, %v1204_v9 }
 0x50d   : > { %v1218_v15 = vsub.f32 %v1210_v8, %v1202_v11 }
 0x50e   : > { %1850 = vmatpush3.bf16.msra.mxu1 %v1222_v59  ;;  %v1224_v16 = vpack.c.bf16 %v1220_v13, %v1219_v12 }
 0x50f   : > { %v1223_v7 = vpack.c.bf16 %v1218_v15, %v1217_v14 }
 0x511   : > { %1851 = vmatprep.subr.bf16.mxu1 %v1223_v7 }
 0x512   : > { %1852 = vmatpush3.bf16.msra.mxu1 %v1223_v7 }
 0x513   : > { %1853 = vmatprep.subr.bf16.mxu1 %v1224_v16 }
 0x516   : > { %1854 = vmatpush3.bf16.msra.mxu1 %v1224_v16 }
 0x519   : > { %1856 = vmatmul.mubr.msk.bf16.vlgmr.msra.gmra.mrb[24].mxu1 %vm601_vm1, %v1946_v5 }
 0x51a   : > { %1859 = vmatprep.mubr.msk.bf16.mxu1 %vm601_vm1, %v1947_v17 }
 0x521   : > { %1860 = vmatmul.mubr.msk.bf16.gmra.mrb[28].mxu1 %vm601_vm1, %v1948_v18 }
 0x5ec   : > { %v1857_v25 = vpop.f32.mrb[24].mxu1 }
 0x5ed   : > { %v1340_v26 = vadd.f32 %v1857_v25, %v1238_v20  ;;  %v1331_v27 = vpop.f32.mrb[25].mxu1 }
 0x5ee   : > { %v1332_v28 = vadd.f32 %v1331_v27, %v1228_v24  ;;  %v1858_v29 = vpop.f32.mrb[26].mxu1 }
 0x5ef   : > { %1364 = vst.msk [vmem:[%s2381_s0 + $0x10] sm:$0xff] %vm929_vm3, %v1340_v26  ;;  %v1376_v30 = vsel %vm929_vm3, %v1340_v26, 0.0  ;;  %v1343_v31 = vadd.f32 %v1858_v29, %v1243_v21  ;;  %v1405_v32 = vmul.f32 %v1340_v26, %v1340_v26  ;;  %v1334_v33 = vpop.f32.mrb[27].mxu1 }
 0x5f0   : > { %1362 = vst.msk [vmem:[%s2381_s0] sm:$0xff] %vm929_vm3, %v1332_v28  ;;  %1377 = vadd.xlane.f32.xlu0 %v1376_v30  ;;  %v1370_v39 = vsel %vm929_vm3, %v1332_v28, 0.0  ;;  %v1335_v41 = vadd.f32 %v1334_v33, %v1233_v19  ;;  %v1403_v40 = vmul.f32 %v1332_v28, %v1332_v28 }
 0x5f1   : > { %1365 = vst.msk [vmem:[%s2381_s0 + $0x18] sm:$0xff] %vm929_vm3, %v1343_v31  ;;  %1371 = vadd.xlane.f32.xlu1 %v1370_v39  ;;  %v1417_v44 = vsel %vm929_vm3, %v1405_v32, 0.0  ;;  %v1379_v46 = vsel %vm929_vm3, %v1343_v31, 0.0  ;;  %v1406_v47 = vmul.f32 %v1343_v31, %v1343_v31 }
 0x5f2   : > { %1363 = vst.msk [vmem:[%s2381_s0 + $0x8] sm:$0xff] %vm929_vm3, %v1335_v41  ;;  %v1373_v37 = vsel %vm929_vm3, %v1335_v41, 0.0  ;;  %v1404_v48 = vmul.f32 %v1335_v41, %v1335_v41  ;;  %v1411_v53 = vsel %vm929_vm3, %v1403_v40, 0.0 }
 0x5f3   : > { %v1420_v45 = vsel %vm929_vm3, %v1406_v47, 0.0 }
 0x5f4   : > { %1418 = vadd.xlane.f32.xlu0 %v1417_v44  ;;  %v1861_v49 = vpop.f32.mrb[28].mxu1  ;;  %v1414_v54 = vsel %vm929_vm3, %v1404_v48, 0.0 }
 0x5f5   : > { %1380 = vadd.xlane.f32.xlu1 %v1379_v46  ;;  %v1356_v51 = vadd.f32 %v1861_v49, %v1258_v42  ;;  %v1347_v52 = vpop.f32.mrb[29].mxu1 }
 0x5f6   : > { %v1348_v34 = vadd.f32 %v1347_v52, %v1248_v22  ;;  %v1862_v36 = vpop.f32.mrb[30].mxu1 }
 0x5f7   : > { %1368 = vst.msk [vmem:[%s2381_s0 + $0x30] sm:$0xff] %vm929_vm3, %v1356_v51  ;;  %v1359_v38 = vadd.f32 %v1862_v36, %v1263_v35  ;;  %v1350_v43 = vpop.f32.mrb[31].mxu1  ;;  %v1388_v55 = vsel %vm929_vm3, %v1356_v51, 0.0  ;;  %v1409_v61 = vmul.f32 %v1356_v51, %v1356_v51 }
 0x5f8   : > { %1374 = vadd.xlane.f32.xlu0 %v1373_v37  ;;  %1366 = vst.msk [vmem:[%s2381_s0 + $0x20] sm:$0xff] %vm929_vm3, %v1348_v34  ;;  %v1351_v50 = vadd.f32 %v1350_v43, %v1253_v23  ;;  %v1382_v56 = vsel %vm929_vm3, %v1348_v34, 0.0  ;;  %v1407_v57 = vmul.f32 %v1348_v34, %v1348_v34 }
 0x5f9   : > { %1421 = vadd.xlane.f32.xlu1 %v1420_v45  ;;  %1369 = vst.msk [vmem:[%s2381_s0 + $0x38] sm:$0xff] %vm929_vm3, %v1359_v38  ;;  %v1391_v0 = vsel %vm929_vm3, %v1359_v38, 0.0  ;;  %v1410_v63 = vmul.f32 %v1359_v38, %v1359_v38  ;;  %v1429_v2 = vsel %vm929_vm3, %v1409_v61, 0.0 }
 0x5fa   : > { %1367 = vst.msk [vmem:[%s2381_s0 + $0x28] sm:$0xff] %vm929_vm3, %v1351_v50  ;;  %v1385_v58 = vsel %vm929_vm3, %v1351_v50, 0.0  ;;  %v1408_v59 = vmul.f32 %v1351_v50, %v1351_v50  ;;  %v1423_v60 = vsel %vm929_vm3, %v1407_v57, 0.0  ;;  %s2040_s0 = smov [#allocation2]  }
 0x5fb   : > { %v1432_v3 = vsel %vm929_vm3, %v1410_v63, 0.0  ;;  %s1975_s22 = sshll.u32 %s2040_s0, 4  ;;  %s1976_s22 = int_to_ptr.vmem [resolvable:$false] %s1975_s22 }
 0x5fc   : > { %1412 = vadd.xlane.f32.xlu0 %v1411_v53  ;;  %v1426_v62 = vsel %vm929_vm3, %v1408_v59, 0.0  ;;  %s1977_s2 = scalar_lea.vmem %s1976_s22, 32  ;;  %p1978_p0 = scmp.lt.s32.totalorder %s1471_s12, %s1976_s22 }
 0x5fd   : > { %1415 = vadd.xlane.f32.xlu1 %v1414_v54  ;;  %p1979_p1 = scmp.lt.s32.totalorder %s1977_s2, %s1971_s25 }
 0x5ff   : > { %p1980_p2 = por %p1979_p1, %p1978_p0 }
 0x600   : > { %1389 = vadd.xlane.f32.xlu0 %v1388_v55 }
 0x601   : > { %1392 = vadd.xlane.f32.xlu1 %v1391_v0  ;;  %p1981_p3 = pnand %p1980_p2, %p1974_p13 }
 0x604   : > { %1383 = vadd.xlane.f32.xlu0 %v1382_v56 }
 0x605   : > { %1386 = vadd.xlane.f32.xlu1 %v1385_v58 }
 0x608   : > { %1424 = vadd.xlane.f32.xlu0 %v1423_v60 }
 0x609   : > { %1427 = vadd.xlane.f32.xlu1 %v1426_v62 }
 0x60c   : > { %1430 = vadd.xlane.f32.xlu0 %v1429_v2 }
 0x60d   : > { %1433 = vadd.xlane.f32.xlu1 %v1432_v3 }
 0x60e   : > { %1984 = shalt.err (!%p1981_p3)
}
 0x60f   : > { %s1985_s21 = scalar_lea.hbm %s2420_s15, 16  ;;  %s1989_s30 = scalar_lea.hbm %s2507_s10, 32 }
 0x610   : > { %p1986_p4 = scmp.ne.s32.totalorder %s2420_s15, %s1985_s21  ;;  %p1990_p9 = scmp.lt.u32.totalorder %s2420_s15, %s2507_s10 }
 0x611   : > { %p1991_p10 = scmp.lt.u32.totalorder %s1989_s30, %s1985_s21  ;;  %p1993_p12 = scmp.lt.u32.totalorder %s1985_s21, %s2420_s15 }
 0x612   : > { %p1987_p7 = pnand %p1986_p4, %p2139_p5 }
 0x613   : > { %p1992_p11 = por %p1991_p10, %p1990_p9 }
 0x614   : > { %p1988_p8 = pneg %p1987_p7 }
 0x615   : > { %p1994_p13 = por %p1993_p12, %p1992_p11 }
 0x617   : > { %p1995_p0 = pnand %p1994_p13, %p1988_p8 }
 0x619   : > { %1998 = shalt.err (!%p1995_p0)
}
 0x61a   : > { %1881 = dma.vmem_to_hbm [thread:$0]  (%p2139_p5), %s1471_s12, 16, %s2420_s15, %s1450_s24   ;;  %vm1394_vm5 = vcmask 7168   ;;  %vm1435_vm6 = vcmask 15368  }
 0x61b   : > { %s2520_s2 = sshll.u32 %s2153_s29, 6 }
 0x61c   : > { %s2446_s0 = scalar_lea.vmem %s2508_s11, %s2520_s2 }
 0x67d   : > { %v1378_v4 = vpop.xlane.xlu0 %1377 }
 0x67e   : > { %v1372_v1 = vpop.xlane.xlu1 %1371  ;;  %1397 = vst.msk [vmem:[%s2446_s0 + $0x10] sm:$0xff] %vm1394_vm5, %v1378_v4 }
 0x67f   : > { %1395 = vst.msk [vmem:[%s2446_s0] sm:$0xff] %vm1394_vm5, %v1372_v1 }
 0x681   : > { %v1419_v6 = vpop.xlane.xlu0 %1418 }
 0x682   : > { %v1381_v8 = vpop.xlane.xlu1 %1380  ;;  %1438 = vst.msk [vmem:[%s2446_s0 + $0x10] sm:$0xff] %vm1435_vm6, %v1419_v6 }
 0x683   : > { %1398 = vst.msk [vmem:[%s2446_s0 + $0x18] sm:$0xff] %vm1394_vm5, %v1381_v8 }
 0x685   : > { %v1375_v9 = vpop.xlane.xlu0 %1374 }
 0x686   : > { %v1422_v10 = vpop.xlane.xlu1 %1421  ;;  %1396 = vst.msk [vmem:[%s2446_s0 + $0x8] sm:$0xff] %vm1394_vm5, %v1375_v9 }
 0x687   : > { %1439 = vst.msk [vmem:[%s2446_s0 + $0x18] sm:$0xff] %vm1435_vm6, %v1422_v10 }
 0x689   : > { %v1413_v11 = vpop.xlane.xlu0 %1412 }
 0x68a   : > { %v1416_v12 = vpop.xlane.xlu1 %1415  ;;  %1436 = vst.msk [vmem:[%s2446_s0] sm:$0xff] %vm1435_vm6, %v1413_v11 }
 0x68b   : > { %1437 = vst.msk [vmem:[%s2446_s0 + $0x8] sm:$0xff] %vm1435_vm6, %v1416_v12 }
 0x68d   : > { %v1390_v13 = vpop.xlane.xlu0 %1389 }
 0x68e   : > { %v1393_v14 = vpop.xlane.xlu1 %1392  ;;  %1401 = vst.msk [vmem:[%s2446_s0 + $0x30] sm:$0xff] %vm1394_vm5, %v1390_v13 }
 0x68f   : > { %1402 = vst.msk [vmem:[%s2446_s0 + $0x38] sm:$0xff] %vm1394_vm5, %v1393_v14 }
 0x691   : > { %v1384_v15 = vpop.xlane.xlu0 %1383 }
 0x692   : > { %v1387_v16 = vpop.xlane.xlu1 %1386  ;;  %1399 = vst.msk [vmem:[%s2446_s0 + $0x20] sm:$0xff] %vm1394_vm5, %v1384_v15 }
 0x693   : > { %1400 = vst.msk [vmem:[%s2446_s0 + $0x28] sm:$0xff] %vm1394_vm5, %v1387_v16 }
 0x695   : > { %v1425_v7 = vpop.xlane.xlu0 %1424 }
 0x696   : > { %v1428_v5 = vpop.xlane.xlu1 %1427  ;;  %1440 = vst.msk [vmem:[%s2446_s0 + $0x20] sm:$0xff] %vm1435_vm6, %v1425_v7 }
 0x697   : > { %1441 = vst.msk [vmem:[%s2446_s0 + $0x28] sm:$0xff] %vm1435_vm6, %v1428_v5 }
 0x699   : > { %v1431_v17 = vpop.xlane.xlu0 %1430 }
 0x69a   : > { %v1434_v18 = vpop.xlane.xlu1 %1433  ;;  %1442 = vst.msk [vmem:[%s2446_s0 + $0x30] sm:$0xff] %vm1435_vm6, %v1431_v17 }
 0x69b   : > { %1443 = vst.msk [vmem:[%s2446_s0 + $0x38] sm:$0xff] %vm1435_vm6, %v1434_v18 }
 0x69c PF: > { %p1887_p5 = scmp.ge.s32.totalorder %s2033_s20, 2  ;;  %s1493_s27 = sand.u32 1, %s2021_s17  }
 0x69d   : > { %s1494_s29 = scalar_lea.sflag [#allocation3], %s1493_s27 }
 0x69e   : > { %p1884_p1 = pnand %p1887_p5, %p2143_p6 }
 0x6a0   : > { %2016 = dma.done.wait (!%p1884_p1), %s1494_s29, 16  }
 0x6a1   : > { %2018 = vsyncadd (!%p1884_p1), %s1494_s29, 4294967280  ;;  %p22_p2 = scmp.ge.s32.totalorder %s2126_s23, 4   ;;  %s2521_s17 = smov %s2025_s18 }
 0x6a2   : > { %s2522_s18 = smov %s2029_s19  ;;  %s2523_s19 = smov %s2137_s26 }
 0x6a3   : > { %s2524_s20 = smov %s2126_s23  ;;  %24 = sbr.rel (!%p22_p2) target bundleno = 7 (0x7), region = 127 }
 0x6aa   :  { %1506 = vsyncpa [#allocation3], 1 }
 0x6ab   :  { %1508 = vsyncpa [#allocation3 + $0x1], 1 }

</bundles_post_ra>
